<compile_context>
chip_gen: v7x
topology: tpu7x:2x2x1
jax: 0.10.0
libtpu: 0.0.40
codegen_flags: <defaults>
</compile_context>

<pallas_src>
import jax
import jax.numpy as jnp
from jax.experimental import pallas as pl
from jax.experimental.pallas import tpu as pltpu

D_IN, H1, H2, D_OUT = 784, 256, 128, 10
OUT_PAD = 128  # lane-dense padded output width


def _round_up(n, m):
    return ((n + m - 1) // m) * m


def _cdiv(a, b):
    return -(-a // b)


def _silu(x):
    # SiLU / swish: x * sigmoid(x).  exp -> EUP, approx reciprocal -> EUP vrcp,
    # keeping the activation off the VALU critical slot.
    return x * pl.reciprocal(1.0 + jnp.exp(-x), approx=True)


def bpnet_kernel(x_ref, w1_ref, b1_ref, w2_ref, b2_ref, w3_ref, b3_ref, o_ref):
    # x arrives as f32 straight from HBM; cast to bf16 in-register for the MXU.
    x = x_ref[...].astype(jnp.bfloat16)                                  # (bm, 784)
    h1 = jnp.dot(x, w1_ref[...], preferred_element_type=jnp.float32) + b1_ref[...]
    h1 = _silu(h1).astype(jnp.bfloat16)                                  # (bm, 256)
    h2 = jnp.dot(h1, w2_ref[...], preferred_element_type=jnp.float32) + b2_ref[...]
    h2 = _silu(h2).astype(jnp.bfloat16)                                  # (bm, 128)
    out = jnp.dot(h2, w3_ref[...], preferred_element_type=jnp.float32) + b3_ref[...]
    o_ref[...] = out.astype(o_ref.dtype)                                 # (bm, 128) bf16, padded


def prepare_params(params):
    """One-time, outside the hot path: bf16 weights + zero-pad the 10-wide head to 128."""
    w1, b1, w2, b2, w3, b3 = params
    w3p = jnp.zeros((H2, OUT_PAD), jnp.float32).at[:, :D_OUT].set(w3)
    b3p = jnp.zeros((1, OUT_PAD), jnp.float32).at[:, :D_OUT].set(b3)
    return (w1.astype(jnp.bfloat16), b1,
            w2.astype(jnp.bfloat16), b2,
            w3p.astype(jnp.bfloat16), b3p)


def bpnet_forward(x, prepared_params, *, bm=1024):
    """Fused MLP forward. x: (B, 784) f32. Returns (B, 10) f32 logits."""
    w1b, b1, w2b, b2, w3b, b3p = prepared_params
    B, d_in = x.shape
    assert d_in == D_IN

    # --- batch tiling ----------------------------------------------------------
    # Big tiles amortize the ~0.35us per-grid-step overhead; round to 16 for bf16
    # sublane packing and size tiles to minimize pad waste.  When one tile would
    # cover the whole (large) batch, split in 2 so both v7x TensorCores get work.
    num_tiles = max(1, _cdiv(B, bm))
    if num_tiles == 1 and B >= 512:
        num_tiles = 2
    bm_eff = _round_up(_cdiv(B, num_tiles), 16)
    Bp = bm_eff * num_tiles

    xp = x if Bp == B else jnp.pad(x, ((0, Bp - B), (0, 0)))
    grid = (num_tiles,)

    # Weights/biases (<1 MiB total) stay resident in VMEM (constant block index).
    # TODO(synk): pipeline_mode=pl.Buffered(1) on these specs would drop the dead
    # second pipeline buffer; skipped as low-value / lowering-version-sensitive.
    wspec = lambda shape: pl.BlockSpec(shape, lambda i: (0, 0))

    cost = pl.CostEstimate(
        flops=2 * Bp * (D_IN * H1 + H1 * H2 + H2 * OUT_PAD),
        transcendentals=Bp * (H1 + H2),
        bytes_accessed=(Bp * D_IN * 4                     # x read (f32)
                        + (w1b.size + w2b.size + w3b.size) * 2
                        + (b1.size + b2.size + b3p.size) * 4
                        + Bp * OUT_PAD * 2),              # out write (bf16)
    )

    out = pl.pallas_call(
        bpnet_kernel,
        out_shape=jax.ShapeDtypeStruct((Bp, OUT_PAD), jnp.bfloat16),
        grid_spec=pltpu.PrefetchScalarGridSpec(
            num_scalar_prefetch=0,
            grid=grid,
            in_specs=[
                pl.BlockSpec((bm_eff, D_IN), lambda i: (i, 0)),   # x tile (f32)
                wspec((D_IN, H1)),                                # W1 (bf16)
                wspec((1, H1)),                                   # b1 (f32)
                wspec((H1, H2)),                                  # W2 (bf16)
                wspec((1, H2)),                                   # b2 (f32)
                wspec((H2, OUT_PAD)),                             # W3 padded (bf16)
                wspec((1, OUT_PAD)),                              # b3 padded (f32)
            ],
            out_specs=pl.BlockSpec((bm_eff, OUT_PAD), lambda i: (i, 0)),
        ),
        compiler_params=pltpu.CompilerParams(
            dimension_semantics=("parallel",),    # batch axis shards across v7x TCs
            vmem_limit_bytes=32 << 20,            # headroom for bm sweeps up to 2048
        ),
        cost_estimate=cost,
    )(xp, w1b, b1, w2b, b2, w3b, b3p)

    # bf16 writeback -> slice the 10 real logits, upcast to f32 for downstream use.
    return out[:B, :D_OUT].astype(jnp.float32)


def init_params(key):
    """Deterministic init matching torch Linear default: U(-1/sqrt(fan_in), +1/sqrt(fan_in))."""
    def linear(key, fan_in, fan_out):
        kw, kb = jax.random.split(key)
        bound = 1.0 / jnp.sqrt(fan_in)
        w = jax.random.uniform(kw, (fan_in, fan_out), jnp.float32, -bound, bound)
        b = jax.random.uniform(kb, (1, fan_out), jnp.float32, -bound, bound)
        return w, b

    k1, k2, k3 = jax.random.split(key, 3)
    w1, b1 = linear(k1, D_IN, H1)
    w2, b2 = linear(k2, H1, H2)
    w3, b3 = linear(k3, H2, D_OUT)
    return (w1, b1, w2, b2, w3, b3)


def bpnet_ref(x, params):
    """Reference forward using the same bf16-input / f32-accumulate precision as the kernel."""
    w1, b1, w2, b2, w3, b3 = params

    def lin(h, w, b):
        return jnp.dot(h.astype(jnp.bfloat16), w.astype(jnp.bfloat16),
                       preferred_element_type=jnp.float32) + b

    h1 = jax.nn.silu(lin(x, w1, b1))
    h2 = jax.nn.silu(lin(h1, w2, b2))
    return lin(h2, w3, b3)


if __name__ == "__main__":
    key = jax.random.PRNGKey(0)
    kx, kp = jax.random.split(key)

    B = 8
    x = jax.random.normal(kx, (B, D_IN), jnp.float32)
    params = init_params(kp)
    prepared = prepare_params(params)          # one-time, outside the hot path

    out = bpnet_forward(x, prepared)
    out = jax.block_until_ready(out)

    ref = bpnet_ref(x, params)
    assert out.shape == (B, D_OUT) and out.dtype == jnp.float32
    assert jnp.allclose(out, ref, atol=2e-2, rtol=2e-2)

    print("KERNEL_OK")
</pallas_src>

<mosaic_0001>
module attributes {stable_mosaic.version = 11 : i64} {
  func.func @bpnet_kernel(%arg0: i32, %arg1: memref<16x784xf32, #tpu.memory_space<vmem>>, %arg2: memref<784x256xbf16, #tpu.memory_space<vmem>>, %arg3: memref<1x256xf32, #tpu.memory_space<vmem>>, %arg4: memref<256x128xbf16, #tpu.memory_space<vmem>>, %arg5: memref<1x128xf32, #tpu.memory_space<vmem>>, %arg6: memref<128x128xbf16, #tpu.memory_space<vmem>>, %arg7: memref<1x128xf32, #tpu.memory_space<vmem>>, %arg8: memref<16x128xbf16, #tpu.memory_space<vmem>>) attributes {dimension_semantics = [#tpu.dimension_semantics<parallel>], iteration_bounds = array<i64: 1>, scalar_prefetch = 0 : i64, scratch_operands = 0 : i64, tpu.core_type = #tpu.core_type<tc>, window_params = [{transform_indices = @transform_0, window_bounds = array<i64: 16, 784>}, {pipeline_mode = #tpu.pipeline_mode<synchronous>, transform_indices = @transform_1, window_bounds = array<i64: 784, 256>}, {pipeline_mode = #tpu.pipeline_mode<synchronous>, transform_indices = @transform_2, window_bounds = array<i64: 1, 256>}, {pipeline_mode = #tpu.pipeline_mode<synchronous>, transform_indices = @transform_3, window_bounds = array<i64: 256, 128>}, {pipeline_mode = #tpu.pipeline_mode<synchronous>, transform_indices = @transform_4, window_bounds = array<i64: 1, 128>}, {pipeline_mode = #tpu.pipeline_mode<synchronous>, transform_indices = @transform_5, window_bounds = array<i64: 128, 128>}, {pipeline_mode = #tpu.pipeline_mode<synchronous>, transform_indices = @transform_6, window_bounds = array<i64: 1, 128>}, {transform_indices = @transform_7, window_bounds = array<i64: 16, 128>}]} {
    %c0 = arith.constant 0 : index
    %c0_0 = arith.constant 0 : index
    %0 = vector.load %arg1[%c0, %c0_0] : memref<16x784xf32, #tpu.memory_space<vmem>>, vector<16x784xf32>
    %1 = arith.truncf %0 : vector<16x784xf32> to vector<16x784xbf16>
    %c0_1 = arith.constant 0 : index
    %c0_2 = arith.constant 0 : index
    %2 = vector.load %arg2[%c0_1, %c0_2] : memref<784x256xbf16, #tpu.memory_space<vmem>>, vector<784x256xbf16>
    %cst = arith.constant dense<0.000000e+00> : vector<16x256xf32>
    %3 = tpu.matmul %1, %2, %cst {dimension_numbers = #tpu.dot_dimension_numbers<[1], [0], [0], [1], [0, 0, 1, 1], [], []>} : vector<16x784xbf16>, vector<784x256xbf16>, vector<16x256xf32> -> vector<16x256xf32>
    %c0_3 = arith.constant 0 : index
    %c0_4 = arith.constant 0 : index
    %4 = vector.load %arg3[%c0_3, %c0_4] : memref<1x256xf32, #tpu.memory_space<vmem>>, vector<1x256xf32>
    %5 = vector.broadcast %4 : vector<1x256xf32> to vector<16x256xf32>
    %6 = arith.addf %3, %5 : vector<16x256xf32>
    %cst_5 = arith.constant 0.000000e+00 : f32
    %7 = vector.broadcast %cst_5 : f32 to vector<16x256xf32>
    %8 = arith.subf %7, %6 : vector<16x256xf32>
    %9 = math.exp %8 : vector<16x256xf32>
    %cst_6 = arith.constant 1.000000e+00 : f32
    %10 = vector.broadcast %cst_6 : f32 to vector<16x256xf32>
    %11 = arith.addf %10, %9 : vector<16x256xf32>
    %12 = tpu.reciprocal %11 {approx = true} : vector<16x256xf32> -> vector<16x256xf32>
    %13 = arith.mulf %6, %12 : vector<16x256xf32>
    %14 = arith.truncf %13 : vector<16x256xf32> to vector<16x256xbf16>
    %c0_7 = arith.constant 0 : index
    %c0_8 = arith.constant 0 : index
    %15 = vector.load %arg4[%c0_7, %c0_8] : memref<256x128xbf16, #tpu.memory_space<vmem>>, vector<256x128xbf16>
    %cst_9 = arith.constant dense<0.000000e+00> : vector<16x128xf32>
    %16 = tpu.matmul %14, %15, %cst_9 {dimension_numbers = #tpu.dot_dimension_numbers<[1], [0], [0], [1], [0, 0, 1, 1], [], []>} : vector<16x256xbf16>, vector<256x128xbf16>, vector<16x128xf32> -> vector<16x128xf32>
    %c0_10 = arith.constant 0 : index
    %c0_11 = arith.constant 0 : index
    %17 = vector.load %arg5[%c0_10, %c0_11] : memref<1x128xf32, #tpu.memory_space<vmem>>, vector<1x128xf32>
    %18 = vector.broadcast %17 : vector<1x128xf32> to vector<16x128xf32>
    %19 = arith.addf %16, %18 : vector<16x128xf32>
    %cst_12 = arith.constant 0.000000e+00 : f32
    %20 = vector.broadcast %cst_12 : f32 to vector<16x128xf32>
    %21 = arith.subf %20, %19 : vector<16x128xf32>
    %22 = math.exp %21 : vector<16x128xf32>
    %cst_13 = arith.constant 1.000000e+00 : f32
    %23 = vector.broadcast %cst_13 : f32 to vector<16x128xf32>
    %24 = arith.addf %23, %22 : vector<16x128xf32>
    %25 = tpu.reciprocal %24 {approx = true} : vector<16x128xf32> -> vector<16x128xf32>
    %26 = arith.mulf %19, %25 : vector<16x128xf32>
    %27 = arith.truncf %26 : vector<16x128xf32> to vector<16x128xbf16>
    %c0_14 = arith.constant 0 : index
    %c0_15 = arith.constant 0 : index
    %28 = vector.load %arg6[%c0_14, %c0_15] : memref<128x128xbf16, #tpu.memory_space<vmem>>, vector<128x128xbf16>
    %cst_16 = arith.constant dense<0.000000e+00> : vector<16x128xf32>
    %29 = tpu.matmul %27, %28, %cst_16 {dimension_numbers = #tpu.dot_dimension_numbers<[1], [0], [0], [1], [0, 0, 1, 1], [], []>} : vector<16x128xbf16>, vector<128x128xbf16>, vector<16x128xf32> -> vector<16x128xf32>
    %c0_17 = arith.constant 0 : index
    %c0_18 = arith.constant 0 : index
    %30 = vector.load %arg7[%c0_17, %c0_18] : memref<1x128xf32, #tpu.memory_space<vmem>>, vector<1x128xf32>
    %31 = vector.broadcast %30 : vector<1x128xf32> to vector<16x128xf32>
    %32 = arith.addf %29, %31 : vector<16x128xf32>
    %33 = arith.truncf %32 : vector<16x128xf32> to vector<16x128xbf16>
    %c0_19 = arith.constant 0 : index
    %c0_20 = arith.constant 0 : index
    %34 = vector.load %arg8[%c0_19, %c0_20] : memref<16x128xbf16, #tpu.memory_space<vmem>>, vector<16x128xbf16>
    tpu.vector_store %arg8[%c0_19, %c0_20], %33 {strides = array<i32>} : memref<16x128xbf16, #tpu.memory_space<vmem>>, vector<16x128xbf16>,
    return
  }
  func.func @transform_0(%arg0: i32) -> (i32, i32) {
    %c0_i32 = arith.constant 0 : i32
    %c0_i32_0 = arith.constant 0 : i32
    return %arg0, %c0_i32 : i32, i32
  }
  func.func @transform_1(%arg0: i32) -> (i32, i32) {
    %c0_i32 = arith.constant 0 : i32
    %c0_i32_0 = arith.constant 0 : i32
    %c0_i32_1 = arith.constant 0 : i32
    return %c0_i32, %c0_i32_0 : i32, i32
  }
  func.func @transform_2(%arg0: i32) -> (i32, i32) {
    %c0_i32 = arith.constant 0 : i32
    %c0_i32_0 = arith.constant 0 : i32
    %c0_i32_1 = arith.constant 0 : i32
    return %c0_i32, %c0_i32_0 : i32, i32
  }
  func.func @transform_3(%arg0: i32) -> (i32, i32) {
    %c0_i32 = arith.constant 0 : i32
    %c0_i32_0 = arith.constant 0 : i32
    %c0_i32_1 = arith.constant 0 : i32
    return %c0_i32, %c0_i32_0 : i32, i32
  }
  func.func @transform_4(%arg0: i32) -> (i32, i32) {
    %c0_i32 = arith.constant 0 : i32
    %c0_i32_0 = arith.constant 0 : i32
    %c0_i32_1 = arith.constant 0 : i32
    return %c0_i32, %c0_i32_0 : i32, i32
  }
  func.func @transform_5(%arg0: i32) -> (i32, i32) {
    %c0_i32 = arith.constant 0 : i32
    %c0_i32_0 = arith.constant 0 : i32
    %c0_i32_1 = arith.constant 0 : i32
    return %c0_i32, %c0_i32_0 : i32, i32
  }
  func.func @transform_6(%arg0: i32) -> (i32, i32) {
    %c0_i32 = arith.constant 0 : i32
    %c0_i32_0 = arith.constant 0 : i32
    %c0_i32_1 = arith.constant 0 : i32
    return %c0_i32, %c0_i32_0 : i32, i32
  }
  func.func @transform_7(%arg0: i32) -> (i32, i32) {
    %c0_i32 = arith.constant 0 : i32
    %c0_i32_0 = arith.constant 0 : i32
    return %arg0, %c0_i32 : i32, i32
  }
}

</mosaic_0001>

<bundles_post_ra>
// kernel: tpu_custom_call.1
= control target key start
LH: loop header
LB: loop body
LE: loop exit
PB: predicated region body
PF: predicated region fallthrough
CT: control target
= control target key end

     0   :  { %12 = vsyncpa [#allocation3], 0  ;;  %s1896_s0 = inlined_call_operand.hbm [shape: f32[16,784], index: 0, kind: input, shape index: {}]   ;;  %s1897_s1 = inlined_call_operand.hbm [shape: bf16[784,256], index: 1, kind: input, shape index: {}]   ;;  %s1898_s2 = inlined_call_operand.vmem [shape: f32[1,256], index: 2, kind: input, shape index: {}]   ;;  %s1899_s3 = inlined_call_operand.hbm [shape: bf16[256,128], index: 3, kind: input, shape index: {}]   ;;  %s1900_s4 = inlined_call_operand.vmem [shape: f32[1,128], index: 4, kind: input, shape index: {}]   ;;  %s1901_s5 = inlined_call_operand.hbm [shape: bf16[128,128], index: 5, kind: input, shape index: {}]   ;;  %s1902_s6 = inlined_call_operand.vmem [shape: f32[1,128], index: 6, kind: input, shape index: {}]   ;;  %s1903_s7 = inlined_call_operand.hbm [shape: bf16[16,128], index: 7, kind: output, shape index: {}]  }
   0x1   :  { %13 = vsyncpa [#allocation6], 0 }
   0x2   :  { %14 = vsyncpa [#allocation9], 0 }
   0x3   :  { %15 = vsyncpa [#allocation4], 0  ;;  %s1764_s24 = smov [#allocation5]   ;;  %s1646_s28 = scalar_lea.hbm %s1897_s1, 12544 }
   0x4   :  { %s33_s25 = sshll.u32 %s1764_s24, 4  ;;  %p1647_p0 = scmp.ne.s32.totalorder %s1897_s1, %s1646_s28  ;;  %s34_s25 = int_to_ptr.vmem [resolvable:$true] %s33_s25 }
   0x5   :  { %p1650_p1 = scmp.lt.u32.totalorder %s1646_s28, %s1897_s1 }
   0x7   :  { %p1652_p2 = pnand %p1650_p1, %p1647_p0 }
   0x9   :  { %1655 = shalt.err (!%p1652_p2)
}
   0xa   :  { %s1656_s10 = scalar_lea.vmem %s34_s25, 12544  ;;  %p1661_p4 = scmp.lt.s32.totalorder %s34_s25, %s34_s25 }
   0xb   :  { %p1657_p3 = scmp.ne.s32.totalorder %s34_s25, %s1656_s10  ;;  %p1662_p5 = scmp.lt.s32.totalorder %s1656_s10, %s1656_s10 }
   0xd   :  { %p1663_p6 = por %p1662_p5, %p1661_p4 }
   0xf   :  { %p1664_p7 = pnand %p1663_p6, %p1657_p3 }
  0x11   :  { %1667 = shalt.err (!%p1664_p7)
}
  0x12   :  { %s1765_s11 = smov 128   ;;  %s1766_s12 = smov 8  }
  0x13   :  { %39 = dma.hbm_to_vmem [thread:$0]  %s1897_s1, 12544, %s34_s25, [#allocation6], %s1765_s11, %s1765_s11, %s1766_s12  }
  0x14   :  { %s1767_s15 = smov [#allocation2]   ;;  %s1668_s19 = scalar_lea.hbm %s1896_s0, 1792 }
  0x15   :  { %s21_s16 = sshll.u32 %s1767_s15, 4  ;;  %p1669_p8 = scmp.ne.s32.totalorder %s1896_s0, %s1668_s19  ;;  %s22_s16 = int_to_ptr.vmem [resolvable:$true] %s21_s16 }
  0x16   :  { %p1672_p9 = scmp.lt.u32.totalorder %s1668_s19, %s1896_s0 }
  0x18   :  { %p1674_p10 = pnand %p1672_p9, %p1669_p8 }
  0x1a   :  { %1677 = shalt.err (!%p1674_p10)
}
  0x1b   :  { %s1678_s24 = scalar_lea.vmem %s22_s16, 1792  ;;  %p1683_p12 = scmp.lt.s32.totalorder %s22_s16, %s22_s16 }
  0x1c   :  { %p1679_p11 = scmp.ne.s32.totalorder %s22_s16, %s1678_s24  ;;  %p1684_p13 = scmp.lt.s32.totalorder %s1678_s24, %s1678_s24 }
  0x1e   :  { %p1685_p0 = por %p1684_p13, %p1683_p12 }
  0x20   :  { %p1686_p1 = pnand %p1685_p0, %p1679_p11 }
  0x22   :  { %1689 = shalt.err (!%p1686_p1)
}
  0x23   :  { %s1768_s1 = smov 896   ;;  %s1769_s25 = smov 56  }
  0x24   :  { %27 = dma.hbm_to_vmem [thread:$0]  %s1896_s0, 1792, %s22_s16, [#allocation3], %s1768_s1, %s1768_s1, %s1769_s25  }
  0x25   :  { %s1770_s28 = smov [#allocation7]   ;;  %s1690_s9 = scalar_lea.hbm %s1899_s3, 2048 }
  0x26   :  { %s47_s29 = sshll.u32 %s1770_s28, 4  ;;  %p1691_p2 = scmp.ne.s32.totalorder %s1899_s3, %s1690_s9  ;;  %s48_s29 = int_to_ptr.vmem [resolvable:$true] %s47_s29 }
  0x27   :  { %p1694_p3 = scmp.lt.u32.totalorder %s1690_s9, %s1899_s3 }
  0x29   :  { %p1696_p4 = pnand %p1694_p3, %p1691_p2 }
  0x2b   :  { %1699 = shalt.err (!%p1696_p4)
}
  0x2c   :  { %s1700_s14 = scalar_lea.vmem %s48_s29, 2048  ;;  %p1705_p6 = scmp.lt.s32.totalorder %s48_s29, %s48_s29 }
  0x2d   :  { %p1701_p5 = scmp.ne.s32.totalorder %s48_s29, %s1700_s14  ;;  %p1706_p7 = scmp.lt.s32.totalorder %s1700_s14, %s1700_s14 }
  0x2f   :  { %p1707_p8 = por %p1706_p7, %p1705_p6 }
  0x31   :  { %p1708_p9 = pnand %p1707_p8, %p1701_p5 }
  0x33   :  { %1711 = shalt.err (!%p1708_p9)
}
  0x34   :  { %s1771_s0 = smov 64   ;;  %s1772_s15 = smov 4  }
  0x35   :  { %53 = dma.hbm_to_vmem [thread:$0]  %s1899_s3, 2048, %s48_s29, [#allocation6], %s1771_s0, %s1771_s0, %s1772_s15  }
  0x36   :  { %s1773_s18 = smov [#allocation8]   ;;  %s1712_s22 = scalar_lea.hbm %s1901_s5, 1024 }
  0x37   :  { %s61_s19 = sshll.u32 %s1773_s18, 4  ;;  %p1713_p10 = scmp.ne.s32.totalorder %s1901_s5, %s1712_s22  ;;  %s62_s19 = int_to_ptr.vmem [resolvable:$true] %s61_s19 }
  0x38   :  { %p1716_p11 = scmp.lt.u32.totalorder %s1712_s22, %s1901_s5 }
  0x3a   :  { %p1718_p12 = pnand %p1716_p11, %p1713_p10 }
  0x3c   :  { %1721 = shalt.err (!%p1718_p12)
}
  0x3d   :  { %s1722_s26 = scalar_lea.vmem %s62_s19, 1024  ;;  %p1727_p0 = scmp.lt.s32.totalorder %s62_s19, %s62_s19 }
  0x3e   :  { %p1723_p13 = scmp.ne.s32.totalorder %s62_s19, %s1722_s26  ;;  %p1728_p1 = scmp.lt.s32.totalorder %s1722_s26, %s1722_s26 }
  0x40   :  { %p1729_p2 = por %p1728_p1, %p1727_p0 }
  0x42   :  { %p1730_p3 = pnand %p1729_p2, %p1723_p13 }
  0x44   :  { %1733 = shalt.err (!%p1730_p3)
}
  0x45   :  { %67 = dma.hbm_to_vmem [thread:$0]  %s1901_s5, 1024, %s62_s19, [#allocation9], %s1771_s0, %s1771_s0, %s1772_s15  }
  0x46   :  { %1756 = dma.done.wait [#allocation3], 1792  }
  0x47   :  { %1757 = vsyncadd [#allocation3], 4294965504 }
  0x48   :  { %1758 = dma.done.wait [#allocation6], 14592  }
  0x49   :  { %1759 = vsyncadd [#allocation6], 4294952704 }
  0x4a   :  { %1760 = dma.done.wait [#allocation9], 1024  }
  0x4b   :  { %1761 = vsyncadd [#allocation9], 4294966272  ;;  %v1451_v0 = vld [vmem:[#allocation5 + $0x104] ss:$8 sps:$4 sm:$0xff]   ;;  %v1453_v1 = vld [vmem:[#allocation5 + $0x100] ss:$8 sps:$4 sm:$0xff]  }
  0x4c   :  { %751 = vmatprep.subr.bf16.mxu0 %v1451_v0  ;;  %v1454_v2 = vld [vmem:[#allocation5 + $0x114] ss:$8 sps:$4 sm:$0xff]   ;;  %v1456_v3 = vld [vmem:[#allocation5 + $0x110] ss:$8 sps:$4 sm:$0xff]   ;;  %v1457_v4 = vld [vmem:[#allocation5 + $0x124] ss:$8 sps:$4 sm:$0xff]  }
  0x4d   :  { %752 = vmatpush1.bf16.msra.mxu0 %v1453_v1  ;;  %v1459_v5 = vld [vmem:[#allocation5 + $0x120] ss:$8 sps:$4 sm:$0xff]   ;;  %v1460_v6 = vld [vmem:[#allocation5 + $0x134] ss:$8 sps:$4 sm:$0xff]   ;;  %v1462_v7 = vld [vmem:[#allocation5 + $0x130] ss:$8 sps:$4 sm:$0xff]  }
  0x4e   :  { %753 = vmatprep.subr.bf16.mxu0 %v1454_v2  ;;  %v1463_v8 = vld [vmem:[#allocation5 + $0x144] ss:$8 sps:$4 sm:$0xff]   ;;  %v1465_v9 = vld [vmem:[#allocation5 + $0x140] ss:$8 sps:$4 sm:$0xff]   ;;  %v1466_v10 = vld [vmem:[#allocation5 + $0x154] ss:$8 sps:$4 sm:$0xff]  }
  0x4f   :  { %v1468_v11 = vld [vmem:[#allocation5 + $0x150] ss:$8 sps:$4 sm:$0xff]   ;;  %v1469_v12 = vld [vmem:[#allocation5 + $0x164] ss:$8 sps:$4 sm:$0xff]   ;;  %v1471_v16 = vld [vmem:[#allocation5 + $0x160] ss:$8 sps:$4 sm:$0xff]  }
  0x50   :  { %v86_v13 = vld [vmem:[#allocation2 + $0x18] sm:$0xff]  ;;  %v93_v14 = vld [vmem:[#allocation2 + $0x50] sm:$0xff]  ;;  %v1472_v17 = vld [vmem:[#allocation5 + $0x174] ss:$8 sps:$4 sm:$0xff]   ;;  %vm704_vm0 = vcmask 130048   ;;  %vm1776_vm1 = vmmov 0  }
  0x51   :  { %754 = vmatpush1.bf16.msra.mxu0 %v1456_v3  ;;  %v100_v15 = vpack.c.bf16 %v93_v14, %v86_v13  ;;  %v1505_v18 = vld [vmem:[#allocation5 + $0x4] ss:$8 sps:$4 sm:$0xff]   ;;  %v1474_v19 = vld [vmem:[#allocation5 + $0x170] ss:$8 sps:$4 sm:$0xff]   ;;  %v1510_v21 = vld [vmem:[#allocation5] ss:$8 sps:$4 sm:$0xff]  }
  0x52   :  { %755 = vmatprep.subr.bf16.mxu0 %v1457_v4  ;;  %v1475_v20 = vld [vmem:[#allocation5 + $0x184] ss:$8 sps:$4 sm:$0xff]   ;;  %708 = vmatprep.subr.bf16.mxu1 %v1505_v18  ;;  %v1511_v22 = vld [vmem:[#allocation5 + $0x14] ss:$8 sps:$4 sm:$0xff]   ;;  %v1477_v23 = vld [vmem:[#allocation5 + $0x180] ss:$8 sps:$4 sm:$0xff]  }
  0x53   :  { %783 = vmatprep.mubr.bf16.mxu0 %v100_v15  ;;  %709 = vmatpush1.bf16.msra.mxu1 %v1510_v21  ;;  %v1516_v24 = vld [vmem:[#allocation5 + $0x10] ss:$8 sps:$4 sm:$0xff]   ;;  %v1517_v25 = vld [vmem:[#allocation5 + $0x24] ss:$8 sps:$4 sm:$0xff]   ;;  %v1478_v26 = vld [vmem:[#allocation5 + $0x194] ss:$8 sps:$4 sm:$0xff]  }
  0x54   :  { %710 = vmatprep.subr.bf16.mxu1 %v1511_v22  ;;  %v1522_v27 = vld [vmem:[#allocation5 + $0x20] ss:$8 sps:$4 sm:$0xff]   ;;  %v1523_v28 = vld [vmem:[#allocation5 + $0x34] ss:$8 sps:$4 sm:$0xff]   ;;  %v1480_v29 = vld [vmem:[#allocation5 + $0x190] ss:$8 sps:$4 sm:$0xff]  }
  0x55   :  { %756 = vmatpush1.bf16.msra.mxu0 %v1459_v5  ;;  %v1481_v30 = vld [vmem:[#allocation5 + $0x1a4] ss:$8 sps:$4 sm:$0xff]   ;;  %v1528_v31 = vld [vmem:[#allocation5 + $0x30] ss:$8 sps:$4 sm:$0xff]   ;;  %v1483_v33 = vld [vmem:[#allocation5 + $0x1a0] ss:$8 sps:$4 sm:$0xff]  }
  0x56   :  { %757 = vmatprep.subr.bf16.mxu0 %v1460_v6  ;;  %v1529_v32 = vld [vmem:[#allocation5 + $0x44] ss:$8 sps:$4 sm:$0xff]   ;;  %v1484_v34 = vld [vmem:[#allocation5 + $0x1b4] ss:$8 sps:$4 sm:$0xff]   ;;  %v1534_v35 = vld [vmem:[#allocation5 + $0x40] ss:$8 sps:$4 sm:$0xff]  }
  0x57   :  { %711 = vmatpush1.bf16.msra.mxu1 %v1516_v24  ;;  %v1535_v36 = vld [vmem:[#allocation5 + $0x54] ss:$8 sps:$4 sm:$0xff]   ;;  %v1486_v37 = vld [vmem:[#allocation5 + $0x1b0] ss:$8 sps:$4 sm:$0xff]   ;;  %v1487_v38 = vld [vmem:[#allocation5 + $0x1c4] ss:$8 sps:$4 sm:$0xff]  }
  0x58   :  { %712 = vmatprep.subr.bf16.mxu1 %v1517_v25  ;;  %v1540_v39 = vld [vmem:[#allocation5 + $0x50] ss:$8 sps:$4 sm:$0xff]   ;;  %v1541_v40 = vld [vmem:[#allocation5 + $0x64] ss:$8 sps:$4 sm:$0xff]   ;;  %v1489_v41 = vld [vmem:[#allocation5 + $0x1c0] ss:$8 sps:$4 sm:$0xff]  }
  0x59   :  { %758 = vmatpush1.bf16.msra.mxu0 %v1462_v7  ;;  %v1490_v42 = vld [vmem:[#allocation5 + $0x1d4] ss:$8 sps:$4 sm:$0xff]   ;;  %v1546_v43 = vld [vmem:[#allocation5 + $0x60] ss:$8 sps:$4 sm:$0xff]   ;;  %v1492_v45 = vld [vmem:[#allocation5 + $0x1d0] ss:$8 sps:$4 sm:$0xff]  }
  0x5a   :  { %759 = vmatprep.subr.bf16.mxu0 %v1463_v8  ;;  %v1547_v44 = vld [vmem:[#allocation5 + $0x74] ss:$8 sps:$4 sm:$0xff]   ;;  %v1493_v46 = vld [vmem:[#allocation5 + $0x1e4] ss:$8 sps:$4 sm:$0xff]   ;;  %v1552_v47 = vld [vmem:[#allocation5 + $0x70] ss:$8 sps:$4 sm:$0xff]  }
  0x5b   :  { %713 = vmatpush1.bf16.msra.mxu1 %v1522_v27  ;;  %v1553_v48 = vld [vmem:[#allocation5 + $0x84] ss:$8 sps:$4 sm:$0xff]   ;;  %v1495_v49 = vld [vmem:[#allocation5 + $0x1e0] ss:$8 sps:$4 sm:$0xff]   ;;  %v1496_v50 = vld [vmem:[#allocation5 + $0x1f4] ss:$8 sps:$4 sm:$0xff]  }
  0x5c   :  { %714 = vmatprep.subr.bf16.mxu1 %v1523_v28  ;;  %v1558_v51 = vld [vmem:[#allocation5 + $0x80] ss:$8 sps:$4 sm:$0xff]   ;;  %v1559_v52 = vld [vmem:[#allocation5 + $0x94] ss:$8 sps:$4 sm:$0xff]   ;;  %v1498_v53 = vld [vmem:[#allocation5 + $0x1f0] ss:$8 sps:$4 sm:$0xff]  }
  0x5d   :  { %760 = vmatpush1.bf16.msra.mxu0 %v1465_v9  ;;  %v85_v54 = vld [vmem:[#allocation2 + $0x10] sm:$0xff]  ;;  %v92_v55 = vld [vmem:[#allocation2 + $0x48] sm:$0xff]  ;;  %v95_v62 = vld [vmem:[#allocation2 + $0x60] sm:$0xff]  ;;  %s1777_s8 = smov [#allocation10]  }
  0x5e   :  { %761 = vmatprep.subr.bf16.mxu0 %v1466_v10  ;;  %v1501_v56 = vld [vmem:[#allocation5 + $0x204] ss:$8 sps:$4 sm:$0xff]   ;;  %v1564_v57 = vld [vmem:[#allocation5 + $0x90] ss:$8 sps:$4 sm:$0xff]   ;;  %v1499_v58 = vld [vmem:[#allocation5 + $0x200] ss:$8 sps:$4 sm:$0xff]   ;;  %v99_v59 = vpack.c.bf16 %v92_v55, %v85_v54 }
  0x5f   :  { %715 = vmatpush1.bf16.msra.mxu1 %v1528_v31  ;;  %v1565_v60 = vld [vmem:[#allocation5 + $0xa4] ss:$8 sps:$4 sm:$0xff]   ;;  %v88_v61 = vld [vmem:[#allocation2 + $0x28] sm:$0xff]  ;;  %v1570_v1 = vld [vmem:[#allocation5 + $0xa0] ss:$8 sps:$4 sm:$0xff]   ;;  %s1222_s9 = sshll.u32 %s1777_s8, 4  ;;  %s1223_s9 = int_to_ptr.vmem [resolvable:$true] %s1222_s9 }
  0x60   :  { %716 = vmatprep.subr.bf16.mxu1 %v1529_v32  ;;  %v1504_v63 = vld [vmem:[#allocation5 + $0x214] ss:$8 sps:$4 sm:$0xff]   ;;  %v102_v0 = vpack.c.bf16 %v95_v62, %v88_v61  ;;  %v1502_v3 = vld [vmem:[#allocation5 + $0x210] ss:$8 sps:$4 sm:$0xff]   ;;  %v1509_v4 = vld [vmem:[#allocation5 + $0x224] ss:$8 sps:$4 sm:$0xff]   ;;  %p1739_p5 = scmp.lt.s32.totalorder %s1223_s9, %s1223_s9 }
  0x61   :  { %762 = vmatpush1.bf16.msra.mxu0 %v1468_v11  ;;  %v1571_v2 = vld [vmem:[#allocation5 + $0xb4] ss:$8 sps:$4 sm:$0xff]   ;;  %v1507_v7 = vld [vmem:[#allocation5 + $0x220] ss:$8 sps:$4 sm:$0xff]   ;;  %v1576_v8 = vld [vmem:[#allocation5 + $0xb0] ss:$8 sps:$4 sm:$0xff]  }
  0x62   :  { %763 = vmatprep.subr.bf16.mxu0 %v1469_v12  ;;  %v84_v5 = vld [vmem:[#allocation2 + $0x8] sm:$0xff]  ;;  %v91_v6 = vld [vmem:[#allocation2 + $0x40] sm:$0xff]  ;;  %v1577_v11 = vld [vmem:[#allocation5 + $0xc4] ss:$8 sps:$4 sm:$0xff]   ;;  %s1734_s10 = scalar_lea.vmem %s1223_s9, 128 }
  0x63   :  { %717 = vmatpush1.bf16.msra.mxu1 %v1534_v35  ;;  %v98_v9 = vpack.c.bf16 %v91_v6, %v84_v5  ;;  %v1515_v10 = vld [vmem:[#allocation5 + $0x234] ss:$8 sps:$4 sm:$0xff]   ;;  %v1582_v12 = vld [vmem:[#allocation5 + $0xc0] ss:$8 sps:$4 sm:$0xff]   ;;  %v1513_v14 = vld [vmem:[#allocation5 + $0x230] ss:$8 sps:$4 sm:$0xff]   ;;  %p1735_p4 = scmp.ne.s32.totalorder %s1223_s9, %s1734_s10  ;;  %p1740_p6 = scmp.lt.s32.totalorder %s1734_s10, %s1734_s10 }
  0x64   :  { %718 = vmatprep.subr.bf16.mxu1 %v1535_v36  ;;  %v1583_v13 = vld [vmem:[#allocation5 + $0xd4] ss:$8 sps:$4 sm:$0xff]   ;;  %v1521_v15 = vld [vmem:[#allocation5 + $0x244] ss:$8 sps:$4 sm:$0xff]   ;;  %v1519_v18 = vld [vmem:[#allocation5 + $0x240] ss:$8 sps:$4 sm:$0xff]  }
  0x65   :  { %764 = vmatpush1.bf16.msra.mxu0 %v1471_v16  ;;  %740 = vmatprep.mubr.bf16.mxu1 %v98_v9  ;;  %v1588_v16 = vld [vmem:[#allocation5 + $0xd0] ss:$8 sps:$4 sm:$0xff]   ;;  %v1595_v21 = vld [vmem:[#allocation5 + $0xf4] ss:$8 sps:$4 sm:$0xff]   ;;  %v1531_v27 = vld [vmem:[#allocation5 + $0x260] ss:$8 sps:$4 sm:$0xff]   ;;  %p1741_p7 = por %p1740_p6, %p1739_p5 }
  0x66   :  { %765 = vmatprep.subr.bf16.mxu0 %v1472_v17  ;;  %v1589_v17 = vld [vmem:[#allocation5 + $0xe4] ss:$8 sps:$4 sm:$0xff]   ;;  %v1525_v22 = vld [vmem:[#allocation5 + $0x250] ss:$8 sps:$4 sm:$0xff]   ;;  %v1539_v28 = vld [vmem:[#allocation5 + $0x274] ss:$8 sps:$4 sm:$0xff]  }
  0x67   :  { %719 = vmatpush1.bf16.msra.mxu1 %v1540_v39  ;;  %v1597_v24 = vld [vmem:[#allocation5 + $0xf0] ss:$8 sps:$4 sm:$0xff]   ;;  %v1545_v31 = vld [vmem:[#allocation5 + $0x284] ss:$8 sps:$4 sm:$0xff]   ;;  %v1543_v32 = vld [vmem:[#allocation5 + $0x280] ss:$8 sps:$4 sm:$0xff]   ;;  %p1742_p8 = pnand %p1741_p7, %p1735_p4 }
  0x68   :  { %720 = vmatprep.subr.bf16.mxu1 %v1541_v40  ;;  %v83_v25 = vld [vmem:[#allocation2] sm:$0xff]  ;;  %v1557_v35 = vld [vmem:[#allocation5 + $0x2a4] ss:$8 sps:$4 sm:$0xff]   ;;  %v1555_v36 = vld [vmem:[#allocation5 + $0x2a0] ss:$8 sps:$4 sm:$0xff]  }
  0x69   :  { %766 = vmatpush1.bf16.msra.mxu0 %v1474_v19  ;;  %v1527_v19 = vld [vmem:[#allocation5 + $0x254] ss:$8 sps:$4 sm:$0xff]   ;;  %v1569_v39 = vld [vmem:[#allocation5 + $0x2c4] ss:$8 sps:$4 sm:$0xff]   ;;  %v1567_v40 = vld [vmem:[#allocation5 + $0x2c0] ss:$8 sps:$4 sm:$0xff]  }
  0x6a   :  { %767 = vmatprep.subr.bf16.mxu0 %v1475_v20  ;;  %v1594_v20 = vld [vmem:[#allocation5 + $0xe0] ss:$8 sps:$4 sm:$0xff]   ;;  %v96_v54 = vld [vmem:[#allocation2 + $0x68] sm:$0xff] }
  0x6b   :  { %721 = vmatpush1.bf16.msra.mxu1 %v1546_v43  ;;  %v1581_v43 = vld [vmem:[#allocation5 + $0x2e4] ss:$8 sps:$4 sm:$0xff]  }
  0x6c   :  { %722 = vmatprep.subr.bf16.mxu1 %v1547_v44  ;;  %v1579_v44 = vld [vmem:[#allocation5 + $0x2e0] ss:$8 sps:$4 sm:$0xff]  }
  0x6d   :  { %768 = vmatpush1.bf16.msra.mxu0 %v1477_v23  ;;  %v1533_v23 = vld [vmem:[#allocation5 + $0x264] ss:$8 sps:$4 sm:$0xff]  }
  0x6e   :  { %769 = vmatprep.subr.bf16.mxu0 %v1478_v26  ;;  %v90_v26 = vld [vmem:[#allocation2 + $0x38] sm:$0xff]  ;;  %v1603_v61 = vld [vmem:[#allocation7 + $0x10] sm:$0xff]  }
  0x6f   :  { %723 = vmatpush1.bf16.msra.mxu1 %v1552_v47  ;;  %v87_v47 = vld [vmem:[#allocation2 + $0x20] sm:$0xff]  ;;  %v1604_v62 = vld [vmem:[#allocation7 + $0x58] sm:$0xff]   ;;  %v1611_v5 = vld [vmem:[#allocation7 + $0x30] sm:$0xff]  }
  0x70   :  { %724 = vmatprep.subr.bf16.mxu1 %v1553_v48  ;;  %v94_v48 = vld [vmem:[#allocation2 + $0x58] sm:$0xff] }
  0x71   :  { %770 = vmatpush1.bf16.msra.mxu0 %v1480_v29  ;;  %v97_v29 = vpack.c.bf16 %v90_v26, %v83_v25  ;;  %v1612_v6 = vld [vmem:[#allocation7 + $0x78] sm:$0xff]  }
  0x72   :  { %771 = vmatprep.subr.bf16.mxu0 %v1481_v30  ;;  %v1537_v30 = vld [vmem:[#allocation5 + $0x270] ss:$8 sps:$4 sm:$0xff]  }
  0x73   :  { %725 = vmatpush1.bf16.msra.mxu1 %v1558_v51  ;;  %v1591_v51 = vld [vmem:[#allocation5 + $0x300] ss:$8 sps:$4 sm:$0xff]  }
  0x74   :  { %726 = vmatprep.subr.bf16.mxu1 %v1559_v52  ;;  %v1774_v52 = vmov 0  }
  0x75   :  { %772 = vmatpush1.bf16.msra.mxu0 %v1483_v33  ;;  %v1551_v33 = vld [vmem:[#allocation5 + $0x294] ss:$8 sps:$4 sm:$0xff]  }
  0x76   :  { %773 = vmatprep.subr.bf16.mxu0 %v1484_v34  ;;  %v1549_v34 = vld [vmem:[#allocation5 + $0x290] ss:$8 sps:$4 sm:$0xff]  }
  0x77   :  { %727 = vmatpush1.bf16.msra.mxu1 %v1564_v57  ;;  %v1599_v57 = vld [vmem:[#allocation7] sm:$0xff]  }
  0x78   :  { %728 = vmatprep.subr.bf16.mxu1 %v1565_v60  ;;  %v1602_v60 = vld [vmem:[#allocation7 + $0x50] sm:$0xff]  }
  0x79   :  { %774 = vmatpush1.bf16.msra.mxu0 %v1486_v37  ;;  %v1563_v37 = vld [vmem:[#allocation5 + $0x2b4] ss:$8 sps:$4 sm:$0xff]  }
  0x7a   :  { %775 = vmatprep.subr.bf16.mxu0 %v1487_v38  ;;  %v1561_v38 = vld [vmem:[#allocation5 + $0x2b0] ss:$8 sps:$4 sm:$0xff]  }
  0x7b   :  { %729 = vmatpush1.bf16.msra.mxu1 %v1570_v1  ;;  %v1607_v1 = vld [vmem:[#allocation7 + $0x20] sm:$0xff]  }
  0x7c   :  { %730 = vmatprep.subr.bf16.mxu1 %v1571_v2  ;;  %v1608_v2 = vld [vmem:[#allocation7 + $0x68] sm:$0xff]  }
  0x7d   :  { %776 = vmatpush1.bf16.msra.mxu0 %v1489_v41  ;;  %v1575_v41 = vld [vmem:[#allocation5 + $0x2d4] ss:$8 sps:$4 sm:$0xff]  }
  0x7e   :  { %777 = vmatprep.subr.bf16.mxu0 %v1490_v42  ;;  %v1573_v42 = vld [vmem:[#allocation5 + $0x2d0] ss:$8 sps:$4 sm:$0xff]  }
  0x7f   :  { %731 = vmatpush1.bf16.msra.mxu1 %v1576_v8 }
  0x80   :  { %732 = vmatprep.subr.bf16.mxu1 %v1577_v11 }
  0x81   :  { %778 = vmatpush1.bf16.msra.mxu0 %v1492_v45  ;;  %v1587_v45 = vld [vmem:[#allocation5 + $0x2f4] ss:$8 sps:$4 sm:$0xff]  }
  0x82   :  { %779 = vmatprep.subr.bf16.mxu0 %v1493_v46  ;;  %v1585_v46 = vld [vmem:[#allocation5 + $0x2f0] ss:$8 sps:$4 sm:$0xff]  }
  0x83   :  { %733 = vmatpush1.bf16.msra.mxu1 %v1582_v12  ;;  %v204_v12 = vlaneseq }
  0x84   :  { %734 = vmatprep.subr.bf16.mxu1 %v1583_v13 }
  0x85   :  { %780 = vmatpush1.bf16.msra.mxu0 %v1495_v49  ;;  %v1593_v49 = vld [vmem:[#allocation5 + $0x304] ss:$8 sps:$4 sm:$0xff]   ;;  %v205_v13 = vshrl.u32 %v204_v12, 7 }
  0x86   :  { %781 = vmatprep.subr.bf16.mxu0 %v1496_v50  ;;  %v101_v50 = vpack.c.bf16 %v94_v48, %v87_v47 }
  0x87   :  { %735 = vmatpush1.bf16.msra.mxu1 %v1588_v16  ;;  %v210_v16 = vsub.s32 1, %v205_v13 }
  0x88   :  { %736 = vmatprep.subr.bf16.mxu1 %v1589_v17 }
  0x89   :  { %782 = vmatpush1.bf16.msra.mxu0 %v1498_v53  ;;  %v89_v53 = vld [vmem:[#allocation2 + $0x30] sm:$0xff] }
  0x8a   :  { %794 = vmatprep.subr.bf16.mxu0 %v1501_v56  ;;  %v103_v55 = vpack.c.bf16 %v96_v54, %v89_v53  ;;  %v1598_v56 = vld [vmem:[#allocation7 + $0x40] sm:$0xff]  }
  0x8b   :  { %737 = vmatpush1.bf16.msra.mxu1 %v1594_v20 }
  0x8c   :  { %784 = vmatmul.mubr.bf16.vlgmr.msra.gmra.mrb[0].mxu0 %v99_v59  ;;  %738 = vmatprep.subr.bf16.mxu1 %v1595_v21  ;;  %v1601_v59 = vld [vmem:[#allocation7 + $0x8] sm:$0xff]  }
  0x8d   :  { %795 = vmatpush1.bf16.msra.mxu0 %v1499_v58  ;;  %826 = vmatprep.mubr.bf16.mxu0 %v102_v0  ;;  %v1600_v58 = vld [vmem:[#allocation7 + $0x48] sm:$0xff]   ;;  %v1606_v0 = vld [vmem:[#allocation7 + $0x60] sm:$0xff]  }
  0x8e   :  { %796 = vmatprep.subr.bf16.mxu0 %v1504_v63  ;;  %v1605_v63 = vld [vmem:[#allocation7 + $0x18] sm:$0xff]  }
  0x8f   :  { %739 = vmatpush1.bf16.msra.mxu1 %v1597_v24 }
  0x90   :  { %1370 = vmatprep.subr.bf16.mxu1 %v1598_v56 }
  0x91   :  { %797 = vmatpush1.bf16.msra.mxu0 %v1502_v3  ;;  %v1609_v3 = vld [vmem:[#allocation7 + $0x28] sm:$0xff]  }
  0x92   :  { %798 = vmatprep.subr.bf16.mxu0 %v1509_v4  ;;  %741 = vmatmul.mubr.bf16.vlgmr.msra.gmra.mrb[0].mxu1 %v97_v29  ;;  %v1610_v4 = vld [vmem:[#allocation7 + $0x70] sm:$0xff]  }
  0x93   :  { %1371 = vmatpush3.bf16.msra.mxu1 %v1599_v57  ;;  %v1614_v57 = vld [vmem:[#allocation8] sm:$0xff]  }
  0x94   :  { %1372 = vmatprep.subr.bf16.mxu1 %v1600_v58  ;;  %v1775_v58 = vmov 0.0  }
  0x95   :  { %799 = vmatpush1.bf16.msra.mxu0 %v1507_v7  ;;  %v1613_v7 = vld [vmem:[#allocation7 + $0x38] sm:$0xff]  }
  0x96   :  { %800 = vmatprep.subr.bf16.mxu0 %v1515_v10 }
  0x97   :  { %1373 = vmatpush3.bf16.msra.mxu1 %v1601_v59  ;;  %v1615_v59 = vld [vmem:[#allocation8 + $0x8] sm:$0xff]  }
  0x98   :  { %1374 = vmatprep.subr.bf16.mxu1 %v1602_v60  ;;  %v1616_v60 = vld [vmem:[#allocation8 + $0x10] sm:$0xff]  }
  0x99   :  { %801 = vmatpush1.bf16.msra.mxu0 %v1513_v14  ;;  %v206_v14 = vsub.s32 0, %v205_v13 }
  0x9a   :  { %802 = vmatprep.subr.bf16.mxu0 %v1521_v15  ;;  %v202_v15 = vld [vmem:[%s1898_s2] sm:$0x3] }
  0x9b   :  { %1375 = vmatpush3.bf16.msra.mxu1 %v1603_v61  ;;  %v207_v17 = vrot.slane %v202_v15, %v206_v14  ;;  %v1617_v61 = vld [vmem:[#allocation8 + $0x18] sm:$0xff]  }
  0x9c   :  { %1376 = vmatprep.subr.bf16.mxu1 %v1604_v62  ;;  %v1618_v62 = vld [vmem:[#allocation8 + $0x20] sm:$0xff]  }
  0x9d   :  { %803 = vmatpush1.bf16.msra.mxu0 %v1519_v18  ;;  %v211_v18 = vrot.slane %v202_v15, %v210_v16 }
  0x9e   :  { %804 = vmatprep.subr.bf16.mxu0 %v1527_v19 }
  0x9f   :  { %1377 = vmatpush3.bf16.msra.mxu1 %v1605_v63  ;;  %v1619_v63 = vld [vmem:[#allocation8 + $0x28] sm:$0xff]  }
  0xa0   :  { %1378 = vmatprep.subr.bf16.mxu1 %v1606_v0  ;;  %v1620_v0 = vld [vmem:[#allocation8 + $0x30] sm:$0xff]  }
  0xa1   :  { %805 = vmatpush1.bf16.msra.mxu0 %v1525_v22 }
  0xa2   :  { %806 = vmatprep.subr.bf16.mxu0 %v1533_v23 }
  0xa3   :  { %1379 = vmatpush3.bf16.msra.mxu1 %v1607_v1  ;;  %v1621_v1 = vld [vmem:[#allocation8 + $0x38] sm:$0xff]  }
  0xa4   :  { %1380 = vmatprep.subr.bf16.mxu1 %v1608_v2 }
  0xa5   :  { %807 = vmatpush1.bf16.msra.mxu0 %v1531_v27 }
  0xa6   :  { %808 = vmatprep.subr.bf16.mxu0 %v1539_v28 }
  0xa7   :  { %1381 = vmatpush3.bf16.msra.mxu1 %v1609_v3  ;;  %v1335_v3 = vld [vmem:[%s1900_s4] ss:$0 sm:$0xff] }
  0xa8   :  { %1382 = vmatprep.subr.bf16.mxu1 %v1610_v4 }
  0xa9   :  { %809 = vmatpush1.bf16.msra.mxu0 %v1537_v30 }
  0xaa   :  { %810 = vmatprep.subr.bf16.mxu0 %v1545_v31 }
  0xab   :  { %1383 = vmatpush3.bf16.msra.mxu1 %v1611_v5 }
  0xac   :  { %1384 = vmatprep.subr.bf16.mxu1 %v1612_v6 }
  0xad   :  { %811 = vmatpush1.bf16.msra.mxu0 %v1543_v32 }
  0xae   :  { %812 = vmatprep.subr.bf16.mxu0 %v1551_v33 }
  0xaf   :  { %1385 = vmatpush3.bf16.msra.mxu1 %v1613_v7 }
  0xb0   :  { %1401 = vmatprep.subr.bf16.mxu1 %v1775_v58 }
  0xb1   :  { %813 = vmatpush1.bf16.msra.mxu0 %v1549_v34 }
  0xb2   :  { %814 = vmatprep.subr.bf16.mxu0 %v1557_v35 }
  0xb5   :  { %815 = vmatpush1.bf16.msra.mxu0 %v1555_v36 }
  0xb6   :  { %816 = vmatprep.subr.bf16.mxu0 %v1563_v37 }
  0xb9   :  { %817 = vmatpush1.bf16.msra.mxu0 %v1561_v38 }
  0xba   :  { %818 = vmatprep.subr.bf16.mxu0 %v1569_v39 }
  0xbd   :  { %819 = vmatpush1.bf16.msra.mxu0 %v1567_v40 }
  0xbe   :  { %820 = vmatprep.subr.bf16.mxu0 %v1575_v41 }
  0xc1   :  { %821 = vmatpush1.bf16.msra.mxu0 %v1573_v42 }
  0xc2   :  { %822 = vmatprep.subr.bf16.mxu0 %v1581_v43 }
  0xc5   :  { %823 = vmatpush1.bf16.msra.mxu0 %v1579_v44 }
  0xc6   :  { %824 = vmatprep.subr.bf16.mxu0 %v1587_v45 }
  0xc9   :  { %825 = vmatpush1.bf16.msra.mxu0 %v1585_v46 }
  0xca   :  { %837 = vmatprep.subr.bf16.mxu0 %v1593_v49 }
  0xcc   :  { %827 = vmatmul.mubr.bf16.vlgmr.msra.gmra.mrb[0].mxu0 %v101_v50 }
  0xcd   :  { %838 = vmatpush1.bf16.msra.mxu0 %v1591_v51  ;;  %869 = vmatprep.mubr.bf16.mxu0 %v1774_v52 }
  0xd8   :  { %1334 = vmatmul.mubr.msk.bf16.vlgmr.msra.gmra.mrb[0].mxu0 %vm704_vm0, %v103_v55 }
 0x165   :  { %v742_v8 = vpop.f32.mrb[0].mxu1 }
 0x166   :  { %v744_v9 = vpop.f32.mrb[1].mxu1  ;;  %v743_v19 = vadd.f32 %v742_v8, %v207_v17 }
 0x167   :  { %v746_v10 = vpop.f32.mrb[2].mxu1  ;;  %v745_v20 = vadd.f32 %v744_v9, %v211_v18 }
 0x168   :  { %v748_v11 = vpop.f32.mrb[3].mxu1  ;;  %v747_v22 = vadd.f32 %v746_v10, %v207_v17 }
 0x169   :  { %v749_v25 = vadd.f32 %v748_v11, %v211_v18 }
 0x1ab   :  { %v871_v21 = vpop.f32.mrb[0].mxu0 }
 0x1ac   :  { %v1422_v23 = vadd.f32 %v871_v21, %v743_v19  ;;  %v873_v24 = vpop.f32.mrb[1].mxu0 }
 0x1ad   :  { %v1424_v26 = vadd.f32 %v873_v24, %v745_v20  ;;  %v875_v27 = vpop.f32.mrb[2].mxu0  ;;  %v1352_v24 = vld [vmem:[%s1902_s6] ss:$0 sm:$0xff] }
 0x1ae   :  { %v880_v28 = vsub.f32 0.0, %v1422_v23  ;;  %v1426_v29 = vadd.f32 %v875_v27, %v747_v22  ;;  %v877_v30 = vpop.f32.mrb[3].mxu0 }
 0x1af   :  { %v881_v31 = vsub.f32 0.0, %v1424_v26  ;;  %v1428_v32 = vadd.f32 %v877_v30, %v749_v25 }
 0x1b0   :  { %v884_v33 = vmul.f32 1.442695, %v880_v28  ;;  %v882_v34 = vsub.f32 0.0, %v1426_v29 }
 0x1b1   :  { %v886_v35 = vmul.f32 1.442695, %v881_v31  ;;  %v883_v36 = vsub.f32 0.0, %v1428_v32 }
 0x1b2   :  { %1622 = vpow2.f32 %v884_v33  ;;  %v888_v37 = vmul.f32 1.442695, %v882_v34 }
 0x1b3   :  { %1624 = vpow2.f32 %v886_v35  ;;  %v890_v38 = vmul.f32 1.442695, %v883_v36 }
 0x1b4   :  { %1626 = vpow2.f32 %v888_v37 }
 0x1b5   :  { %1628 = vpow2.f32 %v890_v38 }
 0x1bc   :  { %v1623_v39 = vpop.eup %1622 }
 0x1bd   :  { %v1625_v40 = vpop.eup %1624  ;;  %v892_v41 = vadd.f32 1.0, %v1623_v39 }
 0x1be   :  { %v1627_v42 = vpop.eup %1626  ;;  %v893_v43 = vadd.f32 1.0, %v1625_v40 }
 0x1bf   :  { %v1629_v44 = vpop.eup %1628  ;;  %1630 = vrcp.f32 %v892_v41  ;;  %v894_v45 = vadd.f32 1.0, %v1627_v42 }
 0x1c0   :  { %1632 = vrcp.f32 %v893_v43  ;;  %v895_v46 = vadd.f32 1.0, %v1629_v44 }
 0x1c1   :  { %1634 = vrcp.f32 %v894_v45 }
 0x1c2   :  { %1636 = vrcp.f32 %v895_v46 }
 0x1c9   :  { %v1631_v47 = vpop.eup %1630 }
 0x1ca   :  { %v1633_v48 = vpop.eup %1632  ;;  %v900_v51 = vmul.f32 %v1631_v47, %v1422_v23 }
 0x1cb   :  { %v1635_v49 = vpop.eup %1634  ;;  %v901_v53 = vmul.f32 %v1633_v48, %v1424_v26 }
 0x1cc   :  { %v1637_v50 = vpop.eup %1636  ;;  %v902_v52 = vmul.f32 %v1635_v49, %v1426_v29 }
 0x1cd   :  { %v903_v54 = vmul.f32 %v1637_v50, %v1428_v32 }
 0x1ce   :  { %v904_v55 = vpack.c.bf16 %v902_v52, %v900_v51 }
 0x1cf   :  { %v905_v56 = vpack.c.bf16 %v903_v54, %v901_v53 }
 0x1d1   :  { %1073 = vmatprep.mubr.bf16.mxu1 %v905_v56 }
 0x1d2   :  { %1074 = vmatmul.mubr.bf16.vlgmr.msra.gmra.mrb[4].mxu1 %v904_v55 }
 0x1d3   :  { %1402 = vmatpush3.bf16.msra.mxu1 %v1614_v57  ;;  %1417 = vmatprep.mubr.msk.bf16.mxu1 %vm1776_vm1, %v1775_v58 }
 0x1d4   :  { %1403 = vmatprep.subr.bf16.mxu1 %v1775_v58 }
 0x1d7   :  { %1404 = vmatpush3.bf16.msra.mxu1 %v1615_v59 }
 0x1d8   :  { %1405 = vmatprep.subr.bf16.mxu1 %v1775_v58 }
 0x1db   :  { %1406 = vmatpush3.bf16.msra.mxu1 %v1616_v60 }
 0x1dc   :  { %1407 = vmatprep.subr.bf16.mxu1 %v1775_v58 }
 0x1df   :  { %1408 = vmatpush3.bf16.msra.mxu1 %v1617_v61 }
 0x1e0   :  { %1409 = vmatprep.subr.bf16.mxu1 %v1775_v58 }
 0x1e3   :  { %1410 = vmatpush3.bf16.msra.mxu1 %v1618_v62 }
 0x1e4   :  { %1411 = vmatprep.subr.bf16.mxu1 %v1775_v58 }
 0x1e7   :  { %1412 = vmatpush3.bf16.msra.mxu1 %v1619_v63 }
 0x1e8   :  { %1413 = vmatprep.subr.bf16.mxu1 %v1775_v58 }
 0x1eb   :  { %1414 = vmatpush3.bf16.msra.mxu1 %v1620_v0 }
 0x1ec   :  { %1415 = vmatprep.subr.bf16.mxu1 %v1775_v58 }
 0x1ef   :  { %1416 = vmatpush3.bf16.msra.mxu1 %v1621_v1 }
 0x2a5   :  { %v1386_v2 = vpop.f32.mrb[4].mxu1 }
 0x2a6   :  { %v1387_v4 = vpop.f32.mrb[5].mxu1 }
 0x2a7   :  { %v1388_v5 = vadd.f32 %v1387_v4, %v1386_v2  ;;  %v1389_v6 = vpop.f32.mrb[6].mxu1 }
 0x2a8   :  { %v1390_v7 = vpop.f32.mrb[7].mxu1 }
 0x2a9   :  { %v1076_v8 = vadd.f32 %v1388_v5, %v1335_v3  ;;  %v1391_v9 = vadd.f32 %v1390_v7, %v1389_v6 }
 0x2ab   :  { %v1082_v10 = vsub.f32 0.0, %v1076_v8  ;;  %v1079_v11 = vadd.f32 %v1391_v9, %v1335_v3 }
 0x2ad   :  { %v1084_v12 = vmul.f32 1.442695, %v1082_v10  ;;  %v1083_v13 = vsub.f32 0.0, %v1079_v11 }
 0x2af   :  { %1638 = vpow2.f32 %v1084_v12  ;;  %v1086_v14 = vmul.f32 1.442695, %v1083_v13 }
 0x2b1   :  { %1640 = vpow2.f32 %v1086_v14 }
 0x2b9   :  { %v1639_v15 = vpop.eup %1638 }
 0x2ba   :  { %v1088_v16 = vadd.f32 1.0, %v1639_v15 }
 0x2bb   :  { %v1641_v17 = vpop.eup %1640 }
 0x2bc   :  { %1642 = vrcp.f32 %v1088_v16  ;;  %v1089_v18 = vadd.f32 1.0, %v1641_v17 }
 0x2be   :  { %1644 = vrcp.f32 %v1089_v18 }
 0x2c6   :  { %v1643_v19 = vpop.eup %1642 }
 0x2c7   :  { %v1092_v21 = vmul.f32 %v1643_v19, %v1076_v8 }
 0x2c8   :  { %v1645_v20 = vpop.eup %1644 }
 0x2c9   :  { %v1093_v22 = vmul.f32 %v1645_v20, %v1079_v11 }
 0x2cb   :  { %v1094_v23 = vpack.c.bf16 %v1093_v22, %v1092_v21 }
 0x2cd   :  { %1418 = vmatmul.mubr.bf16.vlgmr.msra.gmra.mrb[8].mxu1 %v1094_v23 }
 0x3a0   :  { %v1200_v25 = vpop.f32.mrb[8].mxu1 }
 0x3a1   :  { %v1419_v26 = vpop.f32.mrb[9].mxu1  ;;  %v1201_v28 = vadd.f32 %v1352_v24, %v1200_v25 }
 0x3a2   :  { %v1203_v27 = vpop.f32.mrb[10].mxu1 }
 0x3a3   :  { %v1204_v29 = vadd.f32 %v1352_v24, %v1203_v27  ;;  %v1420_v30 = vpop.f32.mrb[11].mxu1 }
 0x3a5   :  { %v1368_v31 = vpack.c.bf16 %v1204_v29, %v1201_v28 }
 0x3a7   :  { %1369 = vst [vmem:[#allocation10] sm:$0xff] %v1368_v31  }
 0x3a8   :  { %1745 = shalt.err (!%p1742_p8)
}
 0x3a9   :  { %s1746_s12 = scalar_lea.hbm %s1903_s7, 128 }
 0x3aa   :  { %p1747_p9 = scmp.ne.s32.totalorder %s1903_s7, %s1746_s12  ;;  %p1750_p10 = scmp.lt.u32.totalorder %s1746_s12, %s1903_s7 }
 0x3ac   :  { %p1752_p11 = pnand %p1750_p10, %p1747_p9 }
 0x3ae   :  { %1755 = shalt.err (!%p1752_p11)
}
 0x3af   :  { %1228 = dma.vmem_to_hbm [thread:$0]  %s1223_s9, 128, %s1903_s7, [#allocation4], %s1771_s0, %s1771_s0, %s1772_s15  }
 0x3b0   :  { %1762 = dma.done.wait [#allocation4], 128  }
 0x3b1   :  { %1763 = vsyncadd [#allocation4], 4294967168 }
 0x3b2   :  { %1232 = vsyncpa [#allocation3], 1 }
 0x3b3   :  { %1233 = vsyncpa [#allocation6], 1 }
 0x3b4   :  { %1234 = vsyncpa [#allocation9], 1 }
 0x3b5   :  { %1235 = vsyncpa [#allocation4], 1 }

</bundles_post_ra>
